<compile_context>
chip_gen: v7x
topology: tpu7x:2x2x1
jax: 0.10.0
libtpu: 0.0.40
codegen_flags: <defaults>
</compile_context>

<pallas_src>
import jax
import jax.numpy as jnp
from jax.experimental import pallas as pl
from jax.experimental.pallas import tpu as pltpu


def _round_up(x, m):
    return (x + m - 1) // m * m


# ---------------------------------------------------------------------------
# Kernel 1: XW = X @ W_padded   (small one-shot right-hand transform)
# ---------------------------------------------------------------------------
def _xw_kernel(x_ref, w_ref, o_ref):
    o_ref[...] = jnp.dot(
        x_ref[...], w_ref[...], preferred_element_type=jnp.float32
    ).astype(o_ref.dtype)


# ---------------------------------------------------------------------------
# Kernel 2: OUT = A @ XW + b    (the HBM-bandwidth-bound aggregation)
# ---------------------------------------------------------------------------
def _make_agg_kernel(bk, xw_resident):
    def kernel(a_ref, xw_ref, b_ref, o_ref, acc_ref):
        k = pl.program_id(1)

        @pl.when(k == 0)
        def _init():
            acc_ref[...] = jnp.zeros_like(acc_ref)

        if xw_resident:
            # XW lives fully in VMEM; take the k-th (bk, F_out_pad) chunk.
            start = pl.multiple_of(k * bk, bk)
            xw = xw_ref[pl.ds(start, bk), :]
        else:
            xw = xw_ref[...]

        # A streams as bf16 (exact 0/1); upcast once per tile, accumulate f32.
        acc_ref[...] += jnp.dot(
            a_ref[...].astype(jnp.float32), xw,
            preferred_element_type=jnp.float32)

        @pl.when(k == pl.num_programs(1) - 1)
        def _finish():
            o_ref[...] = (acc_ref[...] + b_ref[...]).astype(o_ref.dtype)

    return kernel


def gcn_layer(adj, x, w, b):
    """out = (adj @ x) @ w + b  (== adj @ (x @ w) + b), fused Pallas kernels.

    adj : (N, N)   dense adjacency (adj[dst, src] = 1 for edge src->dst)
    x   : (N, F_in) node features
    w   : (F_in, F_out) linear weight (transposed torch layout)
    b   : (F_out,) linear bias
    """
    N, F_in = x.shape
    F_out = w.shape[1]
    assert adj.shape == (N, N)

    n_pad = _round_up(N, 128)
    f_out_pad = _round_up(F_out, 128)        # lane-dense output / accumulator

    # Row tile: keep >= 2 parallel blocks so v7x's two TensorCores both work;
    # only grow to 256 when there are plenty of row blocks to share.
    bm = 256 if (n_pad % 256 == 0 and n_pad // 256 >= 4) else 128
    # Neighbour (reduction) tile: as wide as possible to cut grid steps on the
    # dominant A stream (full width for graphs up to 1024 padded nodes).
    if n_pad <= 1024:
        bk = n_pad
    else:
        bk = next(c for c in (1024, 512, 256, 128) if n_pad % c == 0)

    # Zero padding is exact: padded A columns hit zero XW rows; padded A rows
    # and padded output columns are sliced off at the end.
    if n_pad != N:
        adj = jnp.pad(adj, ((0, n_pad - N), (0, n_pad - N)))
        x = jnp.pad(x, ((0, n_pad - N), (0, 0)))
    w_p = jnp.pad(w.astype(jnp.float32), ((0, 0), (0, f_out_pad - F_out)))
    b_p = jnp.pad(b.astype(jnp.float32), (0, f_out_pad - F_out))
    b_p = b_p.reshape(1, f_out_pad)

    adj_bf16 = adj.astype(jnp.bfloat16)      # 0/1 -> exact in bf16, half bytes
    x_f32 = x.astype(jnp.float32)

    vmem_limit = 32 * 1024 * 1024            # safe on v5e/v6e/v7x, >> our need

    # ---- Kernel 1: XW = X @ W_padded -------------------------------------
    xw = pl.pallas_call(
        _xw_kernel,
        out_shape=jax.ShapeDtypeStruct((n_pad, f_out_pad), jnp.float32),
        grid_spec=pltpu.PrefetchScalarGridSpec(
            num_scalar_prefetch=0,
            grid=(n_pad // bm,),
            in_specs=[
                pl.BlockSpec((bm, F_in), lambda i: (i, 0)),        # X rows
                pl.BlockSpec((F_in, f_out_pad), lambda i: (0, 0)),  # W (bcast)
            ],
            out_specs=pl.BlockSpec((bm, f_out_pad), lambda i: (i, 0)),
        ),
        compiler_params=pltpu.CompilerParams(
            dimension_semantics=("parallel",),
            vmem_limit_bytes=vmem_limit),
    )(x_f32, w_p)

    # ---- Kernel 2: OUT = A @ XW + b ---------------------------------------
    xw_resident = (n_pad * f_out_pad * 4) <= 8 * 1024 * 1024
    if xw_resident:
        # Constant index_map -> fetched once, stays resident in VMEM.
        xw_spec = pl.BlockSpec((n_pad, f_out_pad), lambda i, k: (0, 0))
    else:
        xw_spec = pl.BlockSpec((bk, f_out_pad), lambda i, k: (k, 0))

    out = pl.pallas_call(
        _make_agg_kernel(bk, xw_resident),
        out_shape=jax.ShapeDtypeStruct((n_pad, f_out_pad), x.dtype),
        grid_spec=pltpu.PrefetchScalarGridSpec(
            num_scalar_prefetch=0,
            grid=(n_pad // bm, n_pad // bk),
            in_specs=[
                pl.BlockSpec((bm, bk), lambda i, k: (i, k)),        # adjacency
                xw_spec,                                            # XW
                pl.BlockSpec((1, f_out_pad), lambda i, k: (0, 0)),  # bias
            ],
            out_specs=pl.BlockSpec((bm, f_out_pad), lambda i, k: (i, 0)),
            scratch_shapes=[pltpu.VMEM((bm, f_out_pad), jnp.float32)],
        ),
        compiler_params=pltpu.CompilerParams(
            dimension_semantics=("parallel", "arbitrary"),
            vmem_limit_bytes=vmem_limit),
    )(adj_bf16, xw, b_p)

    return out[:N, :F_out]


def _reference(adj, x, w, b):
    """Pure-JAX reference mirroring the PyTorch/DGL forward exactly."""
    h = jnp.dot(adj, x, precision=jax.lax.Precision.HIGHEST)
    return jnp.dot(h, w, precision=jax.lax.Precision.HIGHEST) + b


if __name__ == "__main__":
    # Small graph consistent with the module: N nodes, in_feats -> out_feats.
    N, F_IN, F_OUT = 256, 64, 32

    root = jax.random.PRNGKey(0)
    k_adj, k_x, k_w, k_b = jax.random.split(root, 4)

    # Random sparse-ish directed graph as a dense 0/1 adjacency matrix.
    adj = (jax.random.uniform(k_adj, (N, N)) < 0.1).astype(jnp.float32)
    x = jax.random.normal(k_x, (N, F_IN), dtype=jnp.float32)

    scale = 1.0 / (F_IN ** 0.5)
    w = jax.random.uniform(k_w, (F_IN, F_OUT), jnp.float32, -scale, scale)
    b = jax.random.uniform(k_b, (F_OUT,), jnp.float32, -scale, scale)

    out = jax.block_until_ready(gcn_layer(adj, x, w, b))

    ref = _reference(adj, x, w, b)
    assert out.shape == (N, F_OUT)
    # bf16 adjacency is exact; remaining diffs are matmul reassociation / MXU
    # f32 rounding, so a modest tolerance is plenty.
    assert jnp.allclose(out, ref, rtol=1e-2, atol=1e-2), "mismatch vs reference"

    print("KERNEL_OK")
</pallas_src>

<mosaic_0001>
module attributes {stable_mosaic.version = 11 : i64} {
  func.func @_xw_kernel(%arg0: i32, %arg1: memref<128x64xf32, #tpu.memory_space<vmem>>, %arg2: memref<64x128xf32, #tpu.memory_space<vmem>>, %arg3: memref<128x128xf32, #tpu.memory_space<vmem>>) attributes {dimension_semantics = [#tpu.dimension_semantics<parallel>], iteration_bounds = array<i64: 2>, scalar_prefetch = 0 : i64, scratch_operands = 0 : i64, tpu.core_type = #tpu.core_type<tc>, window_params = [{transform_indices = @transform_0, window_bounds = array<i64: 128, 64>}, {pipeline_mode = #tpu.pipeline_mode<synchronous>, transform_indices = @transform_1, window_bounds = array<i64: 64, 128>}, {transform_indices = @transform_2, window_bounds = array<i64: 128, 128>}]} {
    %c0 = arith.constant 0 : index
    %c0_0 = arith.constant 0 : index
    %0 = vector.load %arg1[%c0, %c0_0] : memref<128x64xf32, #tpu.memory_space<vmem>>, vector<128x64xf32>
    %c0_1 = arith.constant 0 : index
    %c0_2 = arith.constant 0 : index
    %1 = vector.load %arg2[%c0_1, %c0_2] : memref<64x128xf32, #tpu.memory_space<vmem>>, vector<64x128xf32>
    %cst = arith.constant dense<0.000000e+00> : vector<128x128xf32>
    %2 = tpu.matmul %0, %1, %cst {dimension_numbers = #tpu.dot_dimension_numbers<[1], [0], [0], [1], [0, 0, 1, 1], [], []>} : vector<128x64xf32>, vector<64x128xf32>, vector<128x128xf32> -> vector<128x128xf32>
    %c0_3 = arith.constant 0 : index
    %c0_4 = arith.constant 0 : index
    %3 = vector.load %arg3[%c0_3, %c0_4] : memref<128x128xf32, #tpu.memory_space<vmem>>, vector<128x128xf32>
    tpu.vector_store %arg3[%c0_3, %c0_4], %2 {strides = array<i32>} : memref<128x128xf32, #tpu.memory_space<vmem>>, vector<128x128xf32>,
    return
  }
  func.func @transform_0(%arg0: i32) -> (i32, i32) {
    %c0_i32 = arith.constant 0 : i32
    %c0_i32_0 = arith.constant 0 : i32
    return %arg0, %c0_i32 : i32, i32
  }
  func.func @transform_1(%arg0: i32) -> (i32, i32) {
    %c0_i32 = arith.constant 0 : i32
    %c0_i32_0 = arith.constant 0 : i32
    %c0_i32_1 = arith.constant 0 : i32
    return %c0_i32, %c0_i32_0 : i32, i32
  }
  func.func @transform_2(%arg0: i32) -> (i32, i32) {
    %c0_i32 = arith.constant 0 : i32
    %c0_i32_0 = arith.constant 0 : i32
    return %arg0, %c0_i32 : i32, i32
  }
}

</mosaic_0001>

<bundles_post_ra>
// kernel: tpu_custom_call.1
= control target key start
LH: loop header
LB: loop body
LE: loop exit
PB: predicated region body
PF: predicated region fallthrough
CT: control target
= control target key end

     0   :  { %7 = vsyncpa [#allocation3], 0  ;;  %s878_s0 = inlined_call_operand.vmem [shape: f32[256,64], index: 0, kind: input, shape index: {}]   ;;  %s879_s1 = inlined_call_operand.vmem [shape: f32[64,128], index: 1, kind: input, shape index: {}]   ;;  %s880_s2 = inlined_call_operand.hbm [shape: f32[256,128], index: 2, kind: output, shape index: {}]  }
   0x1   :  { %9 = vsyncpa [#allocation3 + $0x1], 0  ;;  %s695_s9 = smov 0   ;;  %s697_s10 = smov 0  }
   0x2   :  { %s699_s11 = smov 0   ;;  %s701_s12 = smov 0  }
   0x3 LB: > { %s716_s13 = sadd.s32 4294967295, %s675_s12   ;;  %s455_s14 = sadd.s32 4294967294, %s675_s12   ;;  %s675_s12 = sphi %s701_s12, %s886_s12   ;;  %s671_s11 = sphi %s699_s11, %s885_s11   ;;  %s667_s10 = sphi %s697_s10, %s884_s10   ;;  %s663_s9 = sphi %s695_s9, %s883_s9  }
   0x4   : > { %s720_s15 = sadd.s32 1, %s675_s12   ;;  %s69_s16 = sadd.s32 1, %s671_s11 }
   0x5   : > { %s66_s17 = ssub.s32 %s675_s12, %s720_s15  ;;  %p79_p0 = scmp.ne.s32.totalorder %s671_s11, %s667_s10 }
   0x6   : > { %p67_p1 = scmp.eq.s32.totalorder %s66_s17, 0  ;;  %p80_p2 = scmp.eq.s32.totalorder %s716_s13, 1 }
   0x7   : > { %p85_p3 = scmp.ne.s32.totalorder %s667_s10, %s663_s9  ;;  %p86_p4 = scmp.eq.s32.totalorder %s455_s14, 1 }
   0x8   : > { %s731_s18 = scalar_select %p67_p1, %s671_s11, %s69_s16  }
   0x9   : > { %p733_p5 = por %p80_p2, %p79_p0  ;;  %p737_p6 = por %p86_p4, %p85_p3 }
   0xa   : > { %p458_p7 = scmp.ge.s32.totalorder %s675_s12, 1  ;;  %p116_p8 = scmp.lt.s32.totalorder %s675_s12, 3 }
   0xc   : > { %p117_p9 = pnand %p458_p7, %p116_p8 }
   0xd   : > { %v161_v0 = vld [vmem:[%s879_s1] sm:$0xff] (!%p117_p9)  ;;  %v162_v1 = vld [vmem:[%s879_s1 + $0x8] sm:$0xff] (!%p117_p9)  ;;  %v163_v2 = vld [vmem:[%s879_s1 + $0x10] sm:$0xff] (!%p117_p9)  ;;  %s460_s27 = sshll.u32 (!%p117_p9), %s716_s13, 4  ;;  %vm169_vm0 = vcmask (!%p117_p9), 523264   ;;  %s135_s23 = sand.u32 (!%p117_p9), 1, %s667_s10  }
   0xe   : > { %120 = sbr.rel (%p117_p9) target bundleno = 273 (0x111), region = 28  ;;  %v548_v3 = vpack.c.bf16 (!%p117_p9), %v162_v1, %v161_v0  ;;  %v164_v4 = vld [vmem:[%s879_s1 + $0x18] sm:$0xff] (!%p117_p9)  ;;  %p139_p10 = scmp.lt.s32.totalorder (!%p117_p9), %s460_s27, 31  ;;  %v165_v6 = vld [vmem:[%s879_s1 + $0x20] sm:$0xff] (!%p117_p9)  ;;  %v166_v7 = vld [vmem:[%s879_s1 + $0x28] sm:$0xff] (!%p117_p9) }
   0xf   : > { %v552_v5 = vpack.c.bf16 (!%p117_p9), %v164_v4, %v163_v2  ;;  %v556_v8 = vpack.c.bf16 (!%p117_p9), %v166_v7, %v165_v6  ;;  %v167_v9 = vld [vmem:[%s879_s1 + $0x30] sm:$0xff] (!%p117_p9)  ;;  %v168_v10 = vld [vmem:[%s879_s1 + $0x38] sm:$0xff] (!%p117_p9)  ;;  %s459_s24 = sshll.u32 (!%p117_p9), %s135_s23, 7  ;;  %s483_s26 = sshll.u32 (!%p117_p9), %s716_s13, 11 }
  0x10   : > { %549 = vmatprep.subr.bf16.mxu0 (!%p117_p9), %v548_v3  ;;  %564 = vmatprep.subr.bf16.mxu1 (!%p117_p9), %v548_v3  ;;  %v560_v13 = vpack.c.bf16 (!%p117_p9), %v168_v10, %v167_v9  ;;  %s808_s25 = scalar_lea.vmem (!%p117_p9), [#allocation2], %s459_s24  ;;  %s827_s30 = scalar_lea.hbm (!%p117_p9), %s880_s2, %s483_s26 }
  0x11   : > { %551 = vmatpush3.bf16.msra.mxu0 (!%p117_p9), %v548_v3  ;;  %568 = vmatpush3.bf16.msra.mxu1 (!%p117_p9), %v548_v3  ;;  %s837_s13 = scalar_lea.sflag (!%p117_p9), [#allocation3], %s135_s23  ;;  %s677_s4 = smov (!%p117_p9), [#allocation2]  }
  0x12   : > { %553 = vmatprep.subr.bf16.mxu0 (!%p117_p9), %v552_v5  ;;  %565 = vmatprep.subr.bf16.mxu1 (!%p117_p9), %v552_v5  ;;  %s617_s5 = sshll.u32 (!%p117_p9), %s677_s4, 4  ;;  %s618_s5 = int_to_ptr.vmem [resolvable:$false] %s617_s5 }
  0x15   : > { %s888_s27 = smov (!%p139_p10, %s460_s27), 31  ;;  %555 = vmatpush3.bf16.msra.mxu0 %v552_v5  ;;  %569 = vmatpush3.bf16.msra.mxu1 %v552_v5 }
  0x16   : > { %s461_s6 = sshll.u32 %s888_s27, 3  ;;  %557 = vmatprep.subr.bf16.mxu0 %v556_v8  ;;  %566 = vmatprep.subr.bf16.mxu1 %v556_v8  ;;  %s393_s27 = sshll.u32 %s808_s25, 4  ;;  %s829_s27 = int_to_ptr.vmem [resolvable:$true] %s393_s27 }
  0x17   : > { %s771_s22 = scalar_lea.vmem %s878_s0, %s461_s6  ;;  %s613_s3 = scalar_lea.vmem %s829_s27, 2048 }
  0x18   : > { %v145_v11 = vld [vmem:[%s771_s22] sm:$0xff]  ;;  %v146_v14 = vld [vmem:[%s771_s22 + $0x8] sm:$0xff]  ;;  %v147_v16 = vld [vmem:[%s771_s22 + $0x10] sm:$0xff]  ;;  %p614_p11 = scmp.ne.s32.totalorder %s829_s27, %s613_s3  ;;  %s619_s6 = scalar_lea.vmem %s618_s5, 4096 }
  0x19   : > { %v153_v12 = vld [vmem:[%s771_s22 + $0x40] sm:$0xff]  ;;  %524 = vmatprep.mubr.msk.f32.mxu0 %vm169_vm0, %v145_v11  ;;  %559 = vmatpush3.bf16.msra.mxu0 %v556_v8  ;;  %v154_v15 = vld [vmem:[%s771_s22 + $0x48] sm:$0xff]  ;;  %v155_v17 = vld [vmem:[%s771_s22 + $0x50] sm:$0xff]  ;;  %p620_p0 = scmp.lt.s32.totalorder %s829_s27, %s618_s5  ;;  %p621_p1 = scmp.lt.s32.totalorder %s619_s6, %s613_s3 }
  0x1a   : > { %536 = vmatprep.mubr.msk.f32.mxu1 %vm169_vm0, %v153_v12  ;;  %570 = vmatpush3.bf16.msra.mxu1 %v556_v8  ;;  %v148_v18 = vld [vmem:[%s771_s22 + $0x18] sm:$0xff]  ;;  %v149_v20 = vld [vmem:[%s771_s22 + $0x20] sm:$0xff]  ;;  %v150_v22 = vld [vmem:[%s771_s22 + $0x28] sm:$0xff]  ;;  %p615_p12 = pnand %p614_p11, %p733_p5 }
  0x1b   : > { %561 = vmatprep.subr.bf16.mxu0 %v560_v13  ;;  %567 = vmatprep.subr.bf16.mxu1 %v560_v13  ;;  %v156_v19 = vld [vmem:[%s771_s22 + $0x58] sm:$0xff]  ;;  %v157_v21 = vld [vmem:[%s771_s22 + $0x60] sm:$0xff]  ;;  %v158_v23 = vld [vmem:[%s771_s22 + $0x68] sm:$0xff]  ;;  %p622_p2 = por %p621_p1, %p620_p0 }
  0x1c   : > { %v151_v24 = vld [vmem:[%s771_s22 + $0x30] sm:$0xff]  ;;  %v152_v26 = vld [vmem:[%s771_s22 + $0x38] sm:$0xff]  ;;  %p616_p13 = pneg %p615_p12 }
  0x1d   : > { %563 = vmatpush3.bf16.msra.mxu0 %v560_v13  ;;  %v159_v25 = vld [vmem:[%s771_s22 + $0x70] sm:$0xff]  ;;  %v160_v27 = vld [vmem:[%s771_s22 + $0x78] sm:$0xff] }
  0x1e   : > { %571 = vmatpush3.bf16.msra.mxu1 %v560_v13  ;;  %p623_p3 = pnand %p622_p2, %p616_p13 }
  0x20   : > { %525 = vmatmul.mubr.msk.f32.vlgmr.msra.gmra.mrb[0].mxu0 %vm169_vm0, %v146_v14 }
  0x21   : > { %537 = vmatmul.mubr.msk.f32.vlgmr.msra.gmra.mrb[0].mxu1 %vm169_vm0, %v154_v15  ;;  %527 = vmatprep.mubr.msk.f32.mxu0 %vm169_vm0, %v147_v16 }
  0x22   : > { %539 = vmatprep.mubr.msk.f32.mxu1 %vm169_vm0, %v155_v17 }
  0x24   : > { %528 = vmatmul.mubr.msk.f32.gmra.mrb[2].mxu0 %vm169_vm0, %v148_v18 }
  0x25   : > { %540 = vmatmul.mubr.msk.f32.gmra.mrb[2].mxu1 %vm169_vm0, %v156_v19  ;;  %530 = vmatprep.mubr.msk.f32.mxu0 %vm169_vm0, %v149_v20 }
  0x26   : > { %542 = vmatprep.mubr.msk.f32.mxu1 %vm169_vm0, %v157_v21 }
  0x28   : > { %531 = vmatmul.mubr.msk.f32.gmra.mrb[4].mxu0 %vm169_vm0, %v150_v22 }
  0x29   : > { %543 = vmatmul.mubr.msk.f32.gmra.mrb[4].mxu1 %vm169_vm0, %v158_v23  ;;  %533 = vmatprep.mubr.msk.f32.mxu0 %vm169_vm0, %v151_v24 }
  0x2a   : > { %545 = vmatprep.mubr.msk.f32.mxu1 %vm169_vm0, %v159_v25 }
  0x2c   : > { %534 = vmatmul.mubr.msk.f32.gmra.mrb[6].mxu0 %vm169_vm0, %v152_v26 }
  0x2d   : > { %546 = vmatmul.mubr.msk.f32.gmra.mrb[6].mxu1 %vm169_vm0, %v160_v27 }
  0xf3   : > { %v526_v28 = vpop.f32.mrb[0].mxu0 }
  0xf4   : > { %v538_v29 = vpop.f32.mrb[0].mxu1  ;;  %364 = vst [vmem:[%s808_s25 + $0x8] sm:$0xff] %v526_v28  ;;  %v284_v30 = vpop.f32.mrb[1].mxu0 }
  0xf5   : > { %372 = vst [vmem:[%s808_s25 + $0x48] sm:$0xff] %v538_v29  ;;  %v324_v31 = vpop.f32.mrb[1].mxu1  ;;  %363 = vst [vmem:[%s808_s25] sm:$0xff] %v284_v30 }
  0xf6   : > { %371 = vst [vmem:[%s808_s25 + $0x40] sm:$0xff] %v324_v31 }
  0xf7   : > { %v529_v32 = vpop.f32.mrb[2].mxu0 }
  0xf8   : > { %v541_v33 = vpop.f32.mrb[2].mxu1  ;;  %366 = vst [vmem:[%s808_s25 + $0x18] sm:$0xff] %v529_v32  ;;  %v294_v34 = vpop.f32.mrb[3].mxu0 }
  0xf9   : > { %374 = vst [vmem:[%s808_s25 + $0x58] sm:$0xff] %v541_v33  ;;  %v334_v35 = vpop.f32.mrb[3].mxu1  ;;  %365 = vst [vmem:[%s808_s25 + $0x10] sm:$0xff] %v294_v34 }
  0xfa   : > { %373 = vst [vmem:[%s808_s25 + $0x50] sm:$0xff] %v334_v35 }
  0xfb   : > { %v532_v36 = vpop.f32.mrb[4].mxu0 }
  0xfc   : > { %v544_v37 = vpop.f32.mrb[4].mxu1  ;;  %368 = vst [vmem:[%s808_s25 + $0x28] sm:$0xff] %v532_v36  ;;  %v304_v38 = vpop.f32.mrb[5].mxu0 }
  0xfd   : > { %376 = vst [vmem:[%s808_s25 + $0x68] sm:$0xff] %v544_v37  ;;  %v344_v39 = vpop.f32.mrb[5].mxu1  ;;  %367 = vst [vmem:[%s808_s25 + $0x20] sm:$0xff] %v304_v38 }
  0xfe   : > { %375 = vst [vmem:[%s808_s25 + $0x60] sm:$0xff] %v344_v39 }
  0xff   : > { %v535_v40 = vpop.f32.mrb[6].mxu0 }
 0x100   : > { %v547_v41 = vpop.f32.mrb[6].mxu1  ;;  %370 = vst [vmem:[%s808_s25 + $0x38] sm:$0xff] %v535_v40  ;;  %v314_v42 = vpop.f32.mrb[7].mxu0 }
 0x101   : > { %378 = vst [vmem:[%s808_s25 + $0x78] sm:$0xff] %v547_v41  ;;  %v354_v43 = vpop.f32.mrb[7].mxu1  ;;  %369 = vst [vmem:[%s808_s25 + $0x30] sm:$0xff] %v314_v42 }
 0x102   : > { %377 = vst [vmem:[%s808_s25 + $0x70] sm:$0xff] %v354_v43 }
 0x103   : > { %626 = shalt.err (!%p623_p3)
}
 0x104   : > { %s627_s7 = scalar_lea.hbm %s827_s30, 2048  ;;  %s631_s16 = scalar_lea.hbm %s880_s2, 4096 }
 0x105   : > { %p628_p4 = scmp.ne.s32.totalorder %s827_s30, %s627_s7  ;;  %p632_p9 = scmp.lt.u32.totalorder %s827_s30, %s880_s2 }
 0x106   : > { %p633_p10 = scmp.lt.u32.totalorder %s631_s16, %s627_s7  ;;  %p635_p12 = scmp.lt.u32.totalorder %s627_s7, %s827_s30 }
 0x107   : > { %p629_p7 = pnand %p628_p4, %p733_p5 }
 0x108   : > { %p634_p11 = por %p633_p10, %p632_p9 }
 0x109   : > { %p630_p8 = pneg %p629_p7 }
 0x10a   : > { %p636_p13 = por %p635_p12, %p634_p11 }
 0x10c   : > { %p637_p0 = pnand %p636_p13, %p630_p8 }
 0x10e   : > { %640 = shalt.err (!%p637_p0)
}
 0x10f   : > { %s678_s22 = smov 128   ;;  %s679_s23 = smov 8  }
 0x110   : > { %572 = dma.vmem_to_hbm [thread:$0]  (%p733_p5), %s829_s27, 2048, %s827_s30, %s837_s13, %s678_s22, %s678_s22, %s679_s23  }
 0x111 PF: > { %p578_p1 = scmp.ge.s32.totalorder %s675_s12, 2  ;;  %s408_s24 = sand.u32 1, %s663_s9  }
 0x112   : > { %s409_s25 = scalar_lea.sflag [#allocation3], %s408_s24 }
 0x113   : > { %p575_p2 = pnand %p578_p1, %p737_p6 }
 0x115   : > { %658 = dma.done.wait (!%p575_p2), %s409_s25, 2048  }
 0x116   : > { %660 = vsyncadd (!%p575_p2), %s409_s25, 4294965248  ;;  %p12_p3 = scmp.ge.s32.totalorder %s720_s15, 4   ;;  %s883_s9 = smov %s667_s10 }
 0x117   : > { %s884_s10 = smov %s671_s11  ;;  %s885_s11 = smov %s731_s18 }
 0x118   : > { %s886_s12 = smov %s720_s15  ;;  %14 = sbr.rel (!%p12_p3) target bundleno = 3 (0x3), region = 63 }
 0x11f   :  { %414 = vsyncpa [#allocation3], 1 }
 0x120   :  { %416 = vsyncpa [#allocation3 + $0x1], 1 }

</bundles_post_ra>
